<compile_context>
chip_gen: v7x
topology: tpu7x:2x2x1
jax: 0.10.0
libtpu: 0.0.40
codegen_flags: <defaults>
</compile_context>

<pallas_src>
import jax
import jax.numpy as jnp
from jax.experimental import pallas as pl
from jax.experimental.pallas import tpu as pltpu

IN_FEATURES = 4
HIDDEN = 20
OUT_FEATURES = 3


def mlp_kernel(x_ref, w1_ref, b1_ref, w2_ref, b2_ref, o_ref):
    # Hot path: two matmuls + bias + ReLU on the current (TB, ...) batch tile.
    x = x_ref[...]                                                    # (TB, 4)
    h = jnp.dot(x, w1_ref[...],
                preferred_element_type=jnp.float32) + b1_ref[...]     # (TB, 20)
    h = jnp.maximum(h, 0.0)                                           # ReLU
    y = jnp.dot(h, w2_ref[...],
                preferred_element_type=jnp.float32) + b2_ref[...]     # (TB, 3)
    o_ref[...] = y.astype(o_ref.dtype)                                # 12 B/row store


def _cdiv(a, b):
    return -(-a // b)


def _round_up(n, m):
    return ((n + m - 1) // m) * m


def net_forward(x, w1, b1, w2, b2, *, max_block_rows=8192):
    """x: (B, 4) f32; w1: (4, 20); b1: (1, 20); w2: (20, 3); b2: (1, 3)."""
    B, K = x.shape
    assert K == IN_FEATURES

    # Balanced batch tiling: minimize padding waste (<8 rows/tile) instead of
    # rounding B up to a fixed tile.  Keep >=2 tiles (even count) for large B
    # so the "parallel" batch axis can shard across both TCs on v7x.
    num_tiles = _cdiv(B, max_block_rows)
    if num_tiles < 2 and B >= 2048:
        num_tiles = 2
    if num_tiles > 1 and num_tiles % 2:
        num_tiles += 1
    tb = _round_up(_cdiv(B, num_tiles), 8)          # sublane multiple
    b_pad = num_tiles * tb
    if b_pad != B:
        x = jnp.pad(x, ((0, b_pad - B), (0, 0)))

    # VMEM budget: x (tb,4) and out (tb,3) blocks are each lane-padded to
    # (tb,128) f32 in VMEM (512 B/row); double-buffered -> ~2 KiB/row, plus a
    # few KiB of resident weights.  Add generous headroom, stay well under the
    # 64 MiB physical VMEM of v7x.
    pipeline_vmem = 2 * 2 * tb * 128 * 4            # {x,out} x double-buffer
    vmem_limit = min(pipeline_vmem + (8 << 20), 48 << 20)

    weight_bytes = sum(int(a.size) * a.dtype.itemsize for a in (w1, b1, w2, b2))
    cost = pl.CostEstimate(
        flops=2 * b_pad * (IN_FEATURES * HIDDEN + HIDDEN * OUT_FEATURES),
        transcendentals=0,
        bytes_accessed=b_pad * (IN_FEATURES + OUT_FEATURES) * x.dtype.itemsize
        + weight_bytes,
    )

    out = pl.pallas_call(
        mlp_kernel,
        out_shape=jax.ShapeDtypeStruct((b_pad, OUT_FEATURES), x.dtype),
        grid=(num_tiles,),
        in_specs=[
            pl.BlockSpec((tb, IN_FEATURES), lambda i: (i, 0)),          # x: streamed
            pl.BlockSpec((IN_FEATURES, HIDDEN), lambda i: (0, 0)),      # w1: resident
            pl.BlockSpec((1, HIDDEN), lambda i: (0, 0)),                # b1: resident
            pl.BlockSpec((HIDDEN, OUT_FEATURES), lambda i: (0, 0)),     # w2: resident
            pl.BlockSpec((1, OUT_FEATURES), lambda i: (0, 0)),          # b2: resident
        ],
        out_specs=pl.BlockSpec((tb, OUT_FEATURES), lambda i: (i, 0)),   # unpadded (tb,3)
        compiler_params=pltpu.CompilerParams(
            dimension_semantics=("parallel",),      # shard batch tiles across TCs (v7x)
            vmem_limit_bytes=vmem_limit,
        ),
        cost_estimate=cost,
    )(x, w1, b1, w2, b2)

    return out[:B] if b_pad != B else out


def init_params(key):
    # Mimic PyTorch nn.Linear default init: U(-1/sqrt(fan_in), 1/sqrt(fan_in)).
    k1, k2, k3, k4 = jax.random.split(key, 4)
    bound1 = 1.0 / jnp.sqrt(4.0)
    bound2 = 1.0 / jnp.sqrt(20.0)
    w1 = jax.random.uniform(k1, (IN_FEATURES, HIDDEN), jnp.float32, -bound1, bound1)   # hidden.weight.T
    b1 = jax.random.uniform(k2, (1, HIDDEN), jnp.float32, -bound1, bound1)             # hidden.bias
    w2 = jax.random.uniform(k3, (HIDDEN, OUT_FEATURES), jnp.float32, -bound2, bound2)  # out.weight.T
    b2 = jax.random.uniform(k4, (1, OUT_FEATURES), jnp.float32, -bound2, bound2)       # out.bias
    return w1, b1, w2, b2


def _reference(x, w1, b1, w2, b2):
    return jnp.maximum(x @ w1 + b1, 0.0) @ w2 + b2


if __name__ == "__main__":
    key = jax.random.PRNGKey(0)
    kx, kx2, kp = jax.random.split(key, 3)
    w1, b1, w2, b2 = init_params(kp)

    # Small-shape check (single grid step, tb == B == 8).
    B = 8
    x = jax.random.normal(kx, (B, IN_FEATURES), jnp.float32)
    out = jax.block_until_ready(net_forward(x, w1, b1, w2, b2))
    ref = _reference(x, w1, b1, w2, b2)
    assert out.shape == (B, OUT_FEATURES)
    assert jnp.allclose(out, ref, atol=1e-5, rtol=1e-5)

    # Larger check: exercises the multi-tile grid (2 tiles) + batch padding path.
    B2 = 2500
    x2 = jax.random.normal(kx2, (B2, IN_FEATURES), jnp.float32)
    out2 = jax.block_until_ready(net_forward(x2, w1, b1, w2, b2))
    ref2 = _reference(x2, w1, b1, w2, b2)
    assert out2.shape == (B2, OUT_FEATURES)
    assert jnp.allclose(out2, ref2, atol=1e-5, rtol=1e-5)

    print("KERNEL_OK")
</pallas_src>

<mosaic_0001>
module attributes {stable_mosaic.version = 11 : i64} {
  func.func @mlp_kernel(%arg0: i32, %arg1: memref<8x4xf32, #tpu.memory_space<vmem>>, %arg2: memref<4x20xf32, #tpu.memory_space<vmem>>, %arg3: memref<1x20xf32, #tpu.memory_space<vmem>>, %arg4: memref<20x3xf32, #tpu.memory_space<vmem>>, %arg5: memref<1x3xf32, #tpu.memory_space<vmem>>, %arg6: memref<8x3xf32, #tpu.memory_space<vmem>>) attributes {dimension_semantics = [#tpu.dimension_semantics<parallel>], iteration_bounds = array<i64: 1>, scalar_prefetch = 0 : i64, scratch_operands = 0 : i64, tpu.core_type = #tpu.core_type<tc>, window_params = [{transform_indices = @transform_0, window_bounds = array<i64: 8, 4>}, {pipeline_mode = #tpu.pipeline_mode<synchronous>, transform_indices = @transform_1, window_bounds = array<i64: 4, 20>}, {pipeline_mode = #tpu.pipeline_mode<synchronous>, transform_indices = @transform_2, window_bounds = array<i64: 1, 20>}, {pipeline_mode = #tpu.pipeline_mode<synchronous>, transform_indices = @transform_3, window_bounds = array<i64: 20, 3>}, {pipeline_mode = #tpu.pipeline_mode<synchronous>, transform_indices = @transform_4, window_bounds = array<i64: 1, 3>}, {transform_indices = @transform_5, window_bounds = array<i64: 8, 3>}]} {
    %c0 = arith.constant 0 : index
    %c0_0 = arith.constant 0 : index
    %0 = vector.load %arg1[%c0, %c0_0] : memref<8x4xf32, #tpu.memory_space<vmem>>, vector<8x4xf32>
    %c0_1 = arith.constant 0 : index
    %c0_2 = arith.constant 0 : index
    %1 = vector.load %arg2[%c0_1, %c0_2] : memref<4x20xf32, #tpu.memory_space<vmem>>, vector<4x20xf32>
    %cst = arith.constant dense<0.000000e+00> : vector<8x20xf32>
    %2 = tpu.matmul %0, %1, %cst {dimension_numbers = #tpu.dot_dimension_numbers<[1], [0], [0], [1], [0, 0, 1, 1], [], []>} : vector<8x4xf32>, vector<4x20xf32>, vector<8x20xf32> -> vector<8x20xf32>
    %c0_3 = arith.constant 0 : index
    %c0_4 = arith.constant 0 : index
    %3 = vector.load %arg3[%c0_3, %c0_4] : memref<1x20xf32, #tpu.memory_space<vmem>>, vector<1x20xf32>
    %4 = vector.broadcast %3 : vector<1x20xf32> to vector<8x20xf32>
    %5 = arith.addf %2, %4 : vector<8x20xf32>
    %cst_5 = arith.constant 0.000000e+00 : f32
    %6 = vector.broadcast %cst_5 : f32 to vector<8x20xf32>
    %7 = arith.maximumf %5, %6 : vector<8x20xf32>
    %c0_6 = arith.constant 0 : index
    %c0_7 = arith.constant 0 : index
    %8 = vector.load %arg4[%c0_6, %c0_7] : memref<20x3xf32, #tpu.memory_space<vmem>>, vector<20x3xf32>
    %cst_8 = arith.constant dense<0.000000e+00> : vector<8x3xf32>
    %9 = tpu.matmul %7, %8, %cst_8 {dimension_numbers = #tpu.dot_dimension_numbers<[1], [0], [0], [1], [0, 0, 1, 1], [], []>} : vector<8x20xf32>, vector<20x3xf32>, vector<8x3xf32> -> vector<8x3xf32>
    %c0_9 = arith.constant 0 : index
    %c0_10 = arith.constant 0 : index
    %10 = vector.load %arg5[%c0_9, %c0_10] : memref<1x3xf32, #tpu.memory_space<vmem>>, vector<1x3xf32>
    %11 = vector.broadcast %10 : vector<1x3xf32> to vector<8x3xf32>
    %12 = arith.addf %9, %11 : vector<8x3xf32>
    %c0_11 = arith.constant 0 : index
    %c0_12 = arith.constant 0 : index
    %13 = vector.load %arg6[%c0_11, %c0_12] : memref<8x3xf32, #tpu.memory_space<vmem>>, vector<8x3xf32>
    tpu.vector_store %arg6[%c0_11, %c0_12], %12 {strides = array<i32>} : memref<8x3xf32, #tpu.memory_space<vmem>>, vector<8x3xf32>,
    return
  }
  func.func @transform_0(%arg0: i32) -> (i32, i32) {
    %c0_i32 = arith.constant 0 : i32
    %c0_i32_0 = arith.constant 0 : i32
    return %arg0, %c0_i32 : i32, i32
  }
  func.func @transform_1(%arg0: i32) -> (i32, i32) {
    %c0_i32 = arith.constant 0 : i32
    %c0_i32_0 = arith.constant 0 : i32
    %c0_i32_1 = arith.constant 0 : i32
    return %c0_i32, %c0_i32_0 : i32, i32
  }
  func.func @transform_2(%arg0: i32) -> (i32, i32) {
    %c0_i32 = arith.constant 0 : i32
    %c0_i32_0 = arith.constant 0 : i32
    %c0_i32_1 = arith.constant 0 : i32
    return %c0_i32, %c0_i32_0 : i32, i32
  }
  func.func @transform_3(%arg0: i32) -> (i32, i32) {
    %c0_i32 = arith.constant 0 : i32
    %c0_i32_0 = arith.constant 0 : i32
    %c0_i32_1 = arith.constant 0 : i32
    return %c0_i32, %c0_i32_0 : i32, i32
  }
  func.func @transform_4(%arg0: i32) -> (i32, i32) {
    %c0_i32 = arith.constant 0 : i32
    %c0_i32_0 = arith.constant 0 : i32
    %c0_i32_1 = arith.constant 0 : i32
    return %c0_i32, %c0_i32_0 : i32, i32
  }
  func.func @transform_5(%arg0: i32) -> (i32, i32) {
    %c0_i32 = arith.constant 0 : i32
    %c0_i32_0 = arith.constant 0 : i32
    return %arg0, %c0_i32 : i32, i32
  }
}

</mosaic_0001>

<bundles_post_ra>
// kernel: tpu_custom_call.1
= control target key start
LH: loop header
LB: loop body
LE: loop exit
PB: predicated region body
PF: predicated region fallthrough
CT: control target
= control target key end

     0   :  { %vm33_vm0 = vcmask 1043456   ;;  %vm29_vm1 = vcmask 31744   ;;  %v233_v0 = vmov 0.0   ;;  %vm234_vm2 = vmmov 0   ;;  %s292_s1 = inlined_call_operand.vmem [shape: f32[4,20], index: 1, kind: input, shape index: {}]   ;;  %s293_s0 = inlined_call_operand.vmem [shape: f32[8,4], index: 0, kind: input, shape index: {}]   ;;  %s294_s3 = inlined_call_operand.vmem [shape: f32[20,3], index: 3, kind: input, shape index: {}]   ;;  %s295_s2 = inlined_call_operand.vmem [shape: f32[1,20], index: 2, kind: input, shape index: {}]   ;;  %s296_s4 = inlined_call_operand.vmem [shape: f32[1,3], index: 4, kind: input, shape index: {}]   ;;  %s297_s5 = inlined_call_operand.vmem [shape: f32[8,3], index: 5, kind: output, shape index: {}]  }
   0x1   :  { %213 = vmatprep.subr.mxu0 %v233_v0  ;;  %v21_v1 = vld [vmem:[%s292_s1] sm:$0xf]  ;;  %215 = vmatprep.mubr.msk.f32.mxu0 %vm234_vm2, %v233_v0  ;;  %v235_v3 = vmov 0.0|0.0   ;;  %v109_v5 = vld [vmem:[%s294_s3 + $0x8] sm:$0xff]  ;;  %v110_v7 = vld [vmem:[%s294_s3 + $0x10] sm:$0xf] }
   0x2   :  { %v20_v2 = vld [vmem:[%s293_s0] sm:$0xff]  ;;  %214 = vmatpush3.msk.msra.mxu0 %vm33_vm0, %v21_v1  ;;  %227 = vmatprep.subr.bf16.mxu1 %v235_v3  ;;  %vm118_vm3 = vcmask 162816   ;;  %vm195_vm4 = vcmask 23552  }
   0x3   :  { %216 = vmatmul.mubr.msk.f32.vlgmr.msra.gmra.mrb[0].mxu0 %vm29_vm1, %v20_v2  ;;  %224 = vmatprep.mubr.msk.f32.mxu1 %vm234_vm2, %v233_v0  ;;  %v108_v4 = vld [vmem:[%s294_s3] sm:$0xff] }
   0x4   :  { %v228_v6 = vpack.c.bf16 %v109_v5, %v108_v4  ;;  %v201_v8 = vld [vmem:[%s295_s2] ss:$0 sm:$0xff] }
   0x5   :  { %v204_v13 = vld [vmem:[%s296_s4] ss:$0 sm:$0xff] }
   0x6   :  { %229 = vmatpush3.bf16.msra.mxu1 %v228_v6 }
   0x7   :  { %222 = vmatprep.subr.mxu1 %v233_v0 }
   0xa   :  { %223 = vmatpush3.msk.msra.mxu1 %vm33_vm0, %v110_v7 }
  0xd6   :  { %v103_v9 = vpop.f32.mrb[0].mxu0 }
  0xd7   :  { %v104_v10 = vadd.f32 %v201_v8, %v103_v9  ;;  %v217_v11 = vpop.f32.mrb[1].mxu0 }
  0xd9   :  { %v107_v12 = vmax.f32 %v104_v10, 0.0 }
  0xdb   :  { %225 = vmatmul.mubr.msk.f32.vlgmr.msra.gmra.mrb[0].mxu1 %vm118_vm3, %v107_v12 }
 0x1ae   :  { %v191_v14 = vpop.f32.mrb[0].mxu1 }
 0x1af   :  { %v192_v15 = vadd.f32 %v204_v13, %v191_v14  ;;  %v226_v16 = vpop.f32.mrb[1].mxu1 }
 0x1b1   :  { %196 = vst.msk [vmem:[%s297_s5] sm:$0xff] %vm195_vm4, %v192_v15 }

</bundles_post_ra>
